<compile_context>
chip_gen: v6e
topology: v6e:2x2x1
jax: 0.10.0
libtpu: 0.0.40
codegen_flags: <defaults>
</compile_context>

<pallas_src>
import functools

import jax
import jax.numpy as jnp
from jax import lax
from jax.experimental import pallas as pl
from jax.experimental.pallas import tpu as pltpu

MARGIN = 2.0
POS_THRESHOLD = 2.0
NEG_THRESHOLD = 2.0
POS_T2 = POS_THRESHOLD * POS_THRESHOLD
NEG_T2 = NEG_THRESHOLD * NEG_THRESHOLD
NORM_EPS = 1e-12
PAD_POISON = 1e6  # squared norm written for padded rows (see stage 1)

# The kernel drops the relu clamp on (margin - dist); that is only valid while
# every pair passing the negative-threshold test has dist < MARGIN.
assert NEG_THRESHOLD <= MARGIN, "hinge-clamp removal requires NEG_THRESHOLD <= MARGIN"


def _round_up(x: int, m: int) -> int:
    return (x + m - 1) // m * m


def _fold_lanes(x, width):
    """Sum (T, N) lane groups of `width` down to (T, width) with aligned slice-adds."""
    n = x.shape[1]
    out = x[:, :width]
    for off in range(width, n, width):
        out = out + x[:, off:off + width]
    return out


# ---------------------------------------------------------------------------
# Stage 1: row-wise L2 normalization -> bf16 hi/lo split + squared norms.
# ---------------------------------------------------------------------------
def _normalize_kernel(n_rows, tile, x_ref, xh_ref, xl_ref, sqn_ref):
    i = pl.program_id(0)
    x = x_ref[...].astype(jnp.float32)                       # (T, D)
    row_sq = jnp.sum(x * x, axis=1, keepdims=True)           # (T, 1)
    # F.normalize: x / max(||x||, eps)  ==  x * rsqrt(max(||x||^2, eps^2))
    xn = x * lax.rsqrt(jnp.maximum(row_sq, NORM_EPS * NORM_EPS))
    # hi/lo bf16 split hoisted out of the O(B^2) stage: three single-pass bf16
    # MXU matmuls on (xh, xl) reproduce the f32 Gram to ~1e-5 ("bf16_3x").
    xh = xn.astype(jnp.bfloat16)
    xl = (xn - xh.astype(jnp.float32)).astype(jnp.bfloat16)
    xh_ref[...] = xh
    xl_ref[...] = xl
    # ||xn||^2 (== 1 for nonzero rows, ~0 for all-zero rows) keeps the pairwise
    # distance formula exact for zero rows.  Padded rows get a poisoned value so
    # every pair touching them fails the d2 < threshold tests in stage 2 ->
    # no per-pair validity compares needed there.
    sqn = jnp.sum(xn * xn, axis=1, keepdims=True)
    row_idx = i * tile + lax.broadcasted_iota(jnp.int32, (tile, 1), 0)
    sqn_ref[...] = jnp.where(row_idx < n_rows, sqn, PAD_POISON)


# ---------------------------------------------------------------------------
# Stage 2: symmetric (round-robin) tiled pairwise mining + masked reductions.
# ---------------------------------------------------------------------------
def _pair_loss_kernel(tm, tn, fw, grid_cols,
                      xrh_ref, xch_ref, xrl_ref, xcl_ref,
                      lr_ref, lc_ref, sr_ref, sc_ref, acc_ref):
    t = pl.program_id(1)          # round-robin offset; column tile = (i + t) % g

    @pl.when(t == 0)
    def _init():
        acc_ref[...] = jnp.zeros_like(acc_ref)

    dn = (((1,), (1,)), ((), ()))     # contract the feature axis of both tiles
    xrh = xrh_ref[...]                # (TM, D) bf16 row tile (t-invariant)
    xch = xch_ref[...]                # (TN, D) bf16 col tile (streamed)
    # bf16_3x Gram: three native single-pass bf16 MXU matmuls, f32 accumulate.
    gram = lax.dot_general(xrh, xch, dn, preferred_element_type=jnp.float32)
    gram = gram + lax.dot_general(xrl_ref[...], xch, dn,
                                  preferred_element_type=jnp.float32)
    gram = gram + lax.dot_general(xrh, xcl_ref[...], dn,
                                  preferred_element_type=jnp.float32)

    # squared pairwise distances: ||xi||^2 + ||xj||^2 - 2 <xi, xj>
    d2 = jnp.maximum(sr_ref[...] + sc_ref[...] - 2.0 * gram, 0.0)

    label_eq = lr_ref[...] == lc_ref[...]                    # (TM, TN)

    # Self-pair exclusion (Gram-trick self distances are tiny-positive, not 0).
    # Only the t == 0 tile can hold self pairs, so local iotas suffice; the
    # scalar OR makes the mask all-true on every other tile.
    not_self = (lax.broadcasted_iota(jnp.int32, (tm, 1), 0)
                != lax.broadcasted_iota(jnp.int32, (1, tn), 1)) | (t != 0)

    # All compares stay on d2; sqrt only feeds the hinge path.
    pos_mask = label_eq & not_self & (d2 < POS_T2) & (d2 > 0.0)
    neg_mask = jnp.logical_not(label_eq) & (d2 < NEG_T2)

    # relu(margin - dist) clamp dropped: NEG_THRESHOLD <= MARGIN (module-level
    # assert) guarantees margin - dist > 0 for every surviving negative pair;
    # non-surviving elements are zeroed by the where below.
    hinge = MARGIN - jnp.sqrt(d2)

    # Lane-group fold (pure aligned VPU slice-adds, no cross-lane XLU reduce);
    # the final fw -> 1 reduction happens once in the JAX epilogue.
    pos_sum = _fold_lanes(jnp.where(pos_mask, d2, 0.0), fw)
    pos_cnt = _fold_lanes(jnp.where(pos_mask, 1.0, 0.0), fw)
    neg_sum = _fold_lanes(jnp.where(neg_mask, hinge * hinge, 0.0), fw)
    neg_cnt = _fold_lanes(jnp.where(neg_mask, 1.0, 0.0), fw)

    # Symmetry weighting: an off-diagonal tile stands for both (a,b) and (b,a);
    # the diagonal tile (t == 0) and, for even g, the antipodal tile
    # (2*t == g, visited once from each end) are weighted 1.
    w = jnp.where((t == 0) | (2 * t == grid_cols), 1.0, 2.0).astype(jnp.float32)

    # Packed lane-dense accumulator: [pos_sum | pos_cnt | neg_sum | neg_cnt].
    # (f32 counts are exact below 2^24 per lane - fine for realistic batches.)
    acc_ref[:, 0 * fw:1 * fw] += w * pos_sum
    acc_ref[:, 1 * fw:2 * fw] += w * pos_cnt
    acc_ref[:, 2 * fw:3 * fw] += w * neg_sum
    acc_ref[:, 3 * fw:4 * fw] += w * neg_cnt


# ---------------------------------------------------------------------------
# Wrapper
# ---------------------------------------------------------------------------
def contrastive_loss(embeddings: jax.Array, labels: jax.Array, *, tile: int = 512) -> jax.Array:
    """embeddings: (B, D), labels: (B,) -> scalar float32 loss."""
    B, D = embeddings.shape

    B8 = _round_up(B, 8)
    if B8 <= tile:
        T = B8                                    # single tile: any multiple of 8
    else:
        T = _round_up(max(tile, 128), 128)        # tiled regime: lane-aligned tiles
    B_pad = _round_up(B, T)
    pad = B_pad - B
    g = B_pad // T

    emb = embeddings
    lab = labels.astype(jnp.int32)
    if pad:
        emb = jnp.pad(emb, ((0, pad), (0, 0)))
        lab = jnp.pad(lab, (0, pad), constant_values=-1)

    # --- stage 1: normalize once (O(B*D)); emit bf16 hi/lo split + sq norms ---
    xh, xl, sqn = pl.pallas_call(
        functools.partial(_normalize_kernel, B, T),
        grid=(g,),
        in_specs=[pl.BlockSpec((T, D), lambda i: (i, 0))],
        out_specs=[pl.BlockSpec((T, D), lambda i: (i, 0)),
                   pl.BlockSpec((T, D), lambda i: (i, 0)),
                   pl.BlockSpec((T, 1), lambda i: (i, 0))],
        out_shape=[jax.ShapeDtypeStruct((B_pad, D), jnp.bfloat16),
                   jax.ShapeDtypeStruct((B_pad, D), jnp.bfloat16),
                   jax.ShapeDtypeStruct((B_pad, 1), jnp.float32)],
        compiler_params=pltpu.CompilerParams(dimension_semantics=("parallel",)),
    )(emb)

    lab_col = lab.reshape(B_pad, 1)
    lab_row = lab.reshape(1, B_pad)
    sqn_col = sqn                                  # (B_pad, 1)
    sqn_row = sqn.reshape(1, B_pad)                # (1, B_pad)

    fw = 128 if T % 128 == 0 else T                # lane-fold / accumulator width
    h = g // 2 + 1                                 # round-robin column offsets

    row_map = lambda i, t: (i, 0)
    col_map = lambda i, t: ((i + t) % g, 0)
    col_lane_map = lambda i, t: (0, (i + t) % g)

    acc = pl.pallas_call(
        functools.partial(_pair_loss_kernel, T, T, fw, g),
        grid=(g, h),
        in_specs=[
            pl.BlockSpec((T, D), row_map),        # xn_hi, row tile (t-invariant)
            pl.BlockSpec((T, D), col_map),        # xn_hi, col tile (streamed)
            pl.BlockSpec((T, D), row_map),        # xn_lo, row tile
            pl.BlockSpec((T, D), col_map),        # xn_lo, col tile
            pl.BlockSpec((T, 1), row_map),        # labels, row layout
            pl.BlockSpec((1, T), col_lane_map),   # labels, col layout
            pl.BlockSpec((T, 1), row_map),        # ||xn||^2, row layout
            pl.BlockSpec((1, T), col_lane_map),   # ||xn||^2, col layout
        ],
        out_specs=pl.BlockSpec((T, 4 * fw), row_map),
        out_shape=jax.ShapeDtypeStruct((B_pad, 4 * fw), jnp.float32),
        compiler_params=pltpu.CompilerParams(
            dimension_semantics=("parallel", "arbitrary"),
            # 48 MiB fits v7x's 64 MiB VMEM and is comfortable on v5e/v6e.
            vmem_limit_bytes=48 * 1024 * 1024,
        ),
    )(xh, xh, xl, xl, lab_col, lab_row, sqn_col, sqn_row)

    # Tiny epilogue (count-guarded means) in plain JAX.
    ps = jnp.sum(acc[:, 0 * fw:1 * fw])
    pc = jnp.sum(acc[:, 1 * fw:2 * fw])
    ns = jnp.sum(acc[:, 2 * fw:3 * fw])
    nc = jnp.sum(acc[:, 3 * fw:4 * fw])
    pos_loss = jnp.where(pc > 0.0, ps / jnp.maximum(pc, 1.0), 0.0)
    neg_loss = jnp.where(nc > 0.0, ns / jnp.maximum(nc, 1.0), 0.0)
    return pos_loss + neg_loss


# ---------------------------------------------------------------------------
# Pure-JAX reference mirroring the PyTorch module exactly.
# ---------------------------------------------------------------------------
def _reference_loss(embeddings, labels):
    x = embeddings.astype(jnp.float32)
    xn = x / jnp.maximum(jnp.linalg.norm(x, axis=1, keepdims=True), NORM_EPS)
    diff = xn[:, None, :] - xn[None, :, :]
    dist = jnp.sqrt(jnp.maximum(jnp.sum(diff * diff, axis=-1), 0.0))
    label_eq = labels[:, None] == labels[None, :]
    pos_mask = label_eq & (dist < POS_THRESHOLD) & (dist > 0)
    neg_mask = (~label_eq) & (dist < NEG_THRESHOLD)
    pos_cnt = jnp.sum(pos_mask)
    neg_cnt = jnp.sum(neg_mask)
    pos_loss = jnp.where(pos_cnt > 0,
                         jnp.sum(jnp.where(pos_mask, dist ** 2, 0.0)) / jnp.maximum(pos_cnt, 1),
                         0.0)
    hinge = jnp.maximum(MARGIN - dist, 0.0)
    neg_loss = jnp.where(neg_cnt > 0,
                         jnp.sum(jnp.where(neg_mask, hinge ** 2, 0.0)) / jnp.maximum(neg_cnt, 1),
                         0.0)
    return pos_loss + neg_loss


if __name__ == "__main__":
    key = jax.random.PRNGKey(0)

    # Case 1: tiny single-tile batch.
    k1, k2, key = jax.random.split(key, 3)
    emb1 = jax.random.normal(k1, (8, 32), dtype=jnp.float32)
    lab1 = jax.random.randint(k2, (8,), 0, 3, dtype=jnp.int32)
    out1 = contrastive_loss(emb1, lab1)
    jax.block_until_ready(out1)
    ref1 = _reference_loss(emb1, lab1)
    assert jnp.allclose(out1, ref1, atol=2e-4, rtol=2e-4), (out1, ref1)

    # Case 2: odd tile grid (g=3) - exercises 2x off-diagonal weighting + padding.
    k1, k2, key = jax.random.split(key, 3)
    emb2 = jax.random.normal(k1, (300, 48), dtype=jnp.float32)
    lab2 = jax.random.randint(k2, (300,), 0, 10, dtype=jnp.int32)
    out2 = contrastive_loss(emb2, lab2, tile=128)
    jax.block_until_ready(out2)
    ref2 = _reference_loss(emb2, lab2)
    assert jnp.allclose(out2, ref2, atol=2e-4, rtol=2e-4), (out2, ref2)

    # Case 3: even tile grid (g=2) - antipodal weight-1 tile + non-trivial lane fold.
    k1, k2, key = jax.random.split(key, 3)
    emb3 = jax.random.normal(k1, (400, 64), dtype=jnp.float32)
    lab3 = jax.random.randint(k2, (400,), 0, 8, dtype=jnp.int32)
    out3 = contrastive_loss(emb3, lab3, tile=256)
    jax.block_until_ready(out3)
    ref3 = _reference_loss(emb3, lab3)
    assert jnp.allclose(out3, ref3, atol=2e-4, rtol=2e-4), (out3, ref3)

    print("KERNEL_OK")
</pallas_src>

<mosaic_0001>
module attributes {stable_mosaic.version = 11 : i64} {
  func.func @_normalize_kernel(%arg0: i32, %arg1: memref<8x32xf32, #tpu.memory_space<vmem>>, %arg2: memref<8x32xbf16, #tpu.memory_space<vmem>>, %arg3: memref<8x32xbf16, #tpu.memory_space<vmem>>, %arg4: memref<8x1xf32, #tpu.memory_space<vmem>>) attributes {dimension_semantics = [#tpu.dimension_semantics<parallel>], iteration_bounds = array<i64: 1>, scalar_prefetch = 0 : i64, scratch_operands = 0 : i64, tpu.core_type = #tpu.core_type<tc>, window_params = [{transform_indices = @transform_0, window_bounds = array<i64: 8, 32>}, {transform_indices = @transform_1, window_bounds = array<i64: 8, 32>}, {transform_indices = @transform_2, window_bounds = array<i64: 8, 32>}, {transform_indices = @transform_3, window_bounds = array<i64: 8, 1>}]} {
    %c0 = arith.constant 0 : index
    %c0_0 = arith.constant 0 : index
    %0 = vector.load %arg1[%c0, %c0_0] : memref<8x32xf32, #tpu.memory_space<vmem>>, vector<8x32xf32>
    %1 = arith.mulf %0, %0 : vector<8x32xf32>
    %cst = arith.constant dense<0.000000e+00> : vector<8xf32>
    %2 = vector.multi_reduction <add>, %1, %cst [1] : vector<8x32xf32> to vector<8xf32>
    %3 = vector.shape_cast %2 : vector<8xf32> to vector<8x1xf32>
    %cst_1 = arith.constant 1.000000e-24 : f32
    %4 = vector.broadcast %cst_1 : f32 to vector<8x1xf32>
    %5 = arith.maximumf %3, %4 : vector<8x1xf32>
    %6 = math.rsqrt %5 : vector<8x1xf32>
    %7 = vector.broadcast %6 : vector<8x1xf32> to vector<8x32xf32>
    %8 = arith.mulf %0, %7 : vector<8x32xf32>
    %9 = arith.truncf %8 : vector<8x32xf32> to vector<8x32xbf16>
    %10 = arith.extf %9 : vector<8x32xbf16> to vector<8x32xf32>
    %11 = arith.subf %8, %10 : vector<8x32xf32>
    %12 = arith.truncf %11 : vector<8x32xf32> to vector<8x32xbf16>
    %c0_2 = arith.constant 0 : index
    %c0_3 = arith.constant 0 : index
    %13 = vector.load %arg2[%c0_2, %c0_3] : memref<8x32xbf16, #tpu.memory_space<vmem>>, vector<8x32xbf16>
    tpu.vector_store %arg2[%c0_2, %c0_3], %9 {strides = array<i32>} : memref<8x32xbf16, #tpu.memory_space<vmem>>, vector<8x32xbf16>,
    %c0_4 = arith.constant 0 : index
    %c0_5 = arith.constant 0 : index
    %14 = vector.load %arg3[%c0_4, %c0_5] : memref<8x32xbf16, #tpu.memory_space<vmem>>, vector<8x32xbf16>
    tpu.vector_store %arg3[%c0_4, %c0_5], %12 {strides = array<i32>} : memref<8x32xbf16, #tpu.memory_space<vmem>>, vector<8x32xbf16>,
    %15 = arith.mulf %8, %8 : vector<8x32xf32>
    %cst_6 = arith.constant dense<0.000000e+00> : vector<8xf32>
    %16 = vector.multi_reduction <add>, %15, %cst_6 [1] : vector<8x32xf32> to vector<8xf32>
    %17 = vector.shape_cast %16 : vector<8xf32> to vector<8x1xf32>
    %c8_i32 = arith.constant 8 : i32
    %18 = arith.muli %arg0, %c8_i32 : i32
    %19 = tpu.iota {dimensions = array<i32: 0>} : vector<8x1xi32>
    %20 = vector.broadcast %18 : i32 to vector<8x1xi32>
    %21 = arith.addi %20, %19 : vector<8x1xi32>
    %c8_i32_7 = arith.constant 8 : i32
    %22 = vector.broadcast %c8_i32_7 : i32 to vector<8x1xi32>
    %23 = arith.cmpi slt, %21, %22 : vector<8x1xi32>
    %cst_8 = arith.constant 1.000000e+06 : f32
    %24 = vector.broadcast %cst_8 : f32 to vector<8x1xf32>
    %25 = arith.select %23, %17, %24 : vector<8x1xi1>, vector<8x1xf32>
    %c0_9 = arith.constant 0 : index
    %c0_10 = arith.constant 0 : index
    %26 = vector.load %arg4[%c0_9, %c0_10] : memref<8x1xf32, #tpu.memory_space<vmem>>, vector<8x1xf32>
    tpu.vector_store %arg4[%c0_9, %c0_10], %25 {strides = array<i32>} : memref<8x1xf32, #tpu.memory_space<vmem>>, vector<8x1xf32>,
    return
  }
  func.func @transform_0(%arg0: i32) -> (i32, i32) {
    %c0_i32 = arith.constant 0 : i32
    %c0_i32_0 = arith.constant 0 : i32
    return %arg0, %c0_i32 : i32, i32
  }
  func.func @transform_1(%arg0: i32) -> (i32, i32) {
    %c0_i32 = arith.constant 0 : i32
    %c0_i32_0 = arith.constant 0 : i32
    return %arg0, %c0_i32 : i32, i32
  }
  func.func @transform_2(%arg0: i32) -> (i32, i32) {
    %c0_i32 = arith.constant 0 : i32
    %c0_i32_0 = arith.constant 0 : i32
    return %arg0, %c0_i32 : i32, i32
  }
  func.func @transform_3(%arg0: i32) -> (i32, i32) {
    %c0_i32 = arith.constant 0 : i32
    %c0_i32_0 = arith.constant 0 : i32
    return %arg0, %c0_i32 : i32, i32
  }
}

</mosaic_0001>

<bundles_post_ra>
// kernel: tpu_custom_call.1
= control target key start
LH: loop header
LB: loop body
LE: loop exit
PB: predicated region body
PF: predicated region fallthrough
CT: control target
= control target key end

     0   :  { %9 = vsyncpa [#allocation3], 0  ;;  %s193_s0 = inlined_call_operand.hbm [shape: f32[8,32], index: 0, kind: input, shape index: {}]   ;;  %s194_s1 = inlined_call_operand.hbm [shape: bf16[8,32], index: 1, kind: output, shape index: {0}]   ;;  %s195_s2 = inlined_call_operand.hbm [shape: bf16[8,32], index: 2, kind: output, shape index: {1}]   ;;  %s196_s3 = inlined_call_operand.vmem [shape: f32[8,1], index: 3, kind: output, shape index: {2}]  }
   0x1   :  { %10 = vsyncpa [#allocation4], 0 }
   0x2   :  { %11 = vsyncpa [#allocation7], 0  ;;  %s158_s12 = smov [#allocation2]  }
   0x3   :  { %s18_s13 = sshll.u32 %s158_s12, 4  ;;  %s19_s13 = int_to_ptr.vmem [resolvable:$true] %s18_s13 }
   0x4   :  { %s100_s14 = scalar_lea.vmem %s19_s13, 128  ;;  %p105_p1 = scmp.lt.s32.totalorder %s19_s13, %s19_s13 }
   0x5   :  { %p101_p0 = scmp.ne.s32.totalorder %s19_s13, %s100_s14  ;;  %p106_p2 = scmp.lt.s32.totalorder %s100_s14, %s100_s14 }
   0x7   :  { %p107_p3 = por %p106_p2, %p105_p1 }
   0x9   :  { %p108_p4 = pnand %p107_p3, %p101_p0 }
   0xb   :  { %111 = shalt.err (!%p108_p4)
}
   0xc   :  { %21 = dma.hbm_to_vmem [thread:$0]  %s193_s0, 128, %s19_s13, [#allocation3]  }
   0xd   :  { %152 = dma.done.wait [#allocation3], 128  }
   0xe   :  { %153 = vsyncadd [#allocation3], 4294967168  ;;  %v25_v0 = vld [vmem:[#allocation2] sm:$0xff]  ;;  %vm27_vm0 = vcmask 261120   ;;  %vm38_vm1 = vcmask 257024   ;;  %s159_s0 = smov [#allocation5]  }
   0xf   :  { %v26_v1 = vmul.f32 %v25_v0, %v25_v0  ;;  %s60_s17 = sshll.u32 %s159_s0, 4  ;;  %s160_s18 = smov [#allocation6]   ;;  %s61_s17 = int_to_ptr.vmem [resolvable:$true] %s60_s17 }
  0x10   :  { %s70_s19 = sshll.u32 %s160_s18, 4  ;;  %s112_s20 = scalar_lea.vmem %s61_s17, 64  ;;  %s71_s19 = int_to_ptr.vmem [resolvable:$true] %s70_s19 }
  0x11   :  { %v28_v2 = vsel %vm27_vm0, %v26_v1, 0.0  ;;  %p113_p5 = scmp.ne.s32.totalorder %s61_s17, %s112_s20  ;;  %p117_p6 = scmp.lt.s32.totalorder %s61_s17, %s61_s17 }
  0x12   :  { %29 = vadd.xlane.f32.xlu0 %v28_v2  ;;  %p118_p7 = scmp.lt.s32.totalorder %s112_s20, %s112_s20 }
  0x14   :  { %p119_p8 = por %p118_p7, %p117_p6 }
  0x16   :  { %p120_p9 = pnand %p119_p8, %p113_p5 }
  0x9b   :  { %v30_v3 = vpop.xlane.xlu0 %29 }
  0x9c   :  { %v31_v4 = vmax.f32 %v30_v3, 1e-24 }
  0x9e   :  { %90 = vrsqrt.f32 %v31_v4 }
  0xab   :  { %v91_v5 = vpop.eup %90 }
  0xac   :  { %v33_v6 = vmul.f32 %v91_v5, %v25_v0 }
  0xae   :  { %v41_v7 = vmul.f32 %v33_v6, %v33_v6  ;;  %v34_v8 = vpack.c.bf16 %v33_v6, %v33_v6 }
  0xb0   :  { %v42_v9 = vsel %vm27_vm0, %v41_v7, 0.0  ;;  %v35_v10 = vunpack.c.l.bf16 %v34_v8  ;;  %39 = vst.msk [vmem:[#allocation5] sm:$0xf] %vm38_vm1, %v34_v8 }
  0xb1   :  { %43 = vadd.xlane.f32.xlu0 %v42_v9 }
  0xb2   :  { %v36_v11 = vsub.f32 %v33_v6, %v35_v10 }
  0xb4   :  { %v37_v12 = vpack.c.bf16 %v36_v11, %v36_v11 }
  0xb6   :  { %40 = vst.msk [vmem:[#allocation6] sm:$0xf] %vm38_vm1, %v37_v12 }
  0xb7   :  { %123 = shalt.err (!%p120_p9)
}
  0xb8   :  { %63 = dma.vmem_to_hbm [thread:$0]  %s61_s17, 64, %s194_s1, [#allocation4]  }
  0xb9   :  { %s132_s23 = scalar_lea.vmem %s71_s19, 64  ;;  %p137_p11 = scmp.lt.s32.totalorder %s71_s19, %s71_s19 }
  0xba   :  { %p133_p10 = scmp.ne.s32.totalorder %s71_s19, %s132_s23  ;;  %p138_p12 = scmp.lt.s32.totalorder %s132_s23, %s132_s23 }
  0xbc   :  { %p139_p13 = por %p138_p12, %p137_p11 }
  0xbe   :  { %p140_p0 = pnand %p139_p13, %p133_p10 }
  0xc0   :  { %143 = shalt.err (!%p140_p0)
}
  0xc1   :  { %73 = dma.vmem_to_hbm [thread:$0]  %s71_s19, 64, %s195_s2, [#allocation7]   ;;  %vm52_vm2 = vcmask 7168  }
 0x13a   :  { %v44_v13 = vpop.xlane.xlu0 %43 }
 0x13b   :  { %53 = vst.msk [vmem:[%s196_s3] sm:$0xff] %vm52_vm2, %v44_v13 }
 0x13c   :  { %154 = dma.done.wait [#allocation4], 64  }
 0x13d   :  { %155 = vsyncadd [#allocation4], 4294967232 }
 0x13e   :  { %156 = dma.done.wait [#allocation7], 64  }
 0x13f   :  { %157 = vsyncadd [#allocation7], 4294967232 }
 0x140   :  { %84 = vsyncpa [#allocation3], 1 }
 0x141   :  { %85 = vsyncpa [#allocation4], 1 }
 0x142   :  { %86 = vsyncpa [#allocation7], 1 }

</bundles_post_ra>
